<compile_context>
chip_gen: v7x
topology: tpu7x:2x2x1
jax: 0.10.0
libtpu: 0.0.40
codegen_flags: <defaults>
</compile_context>

<pallas_src>
import math

import jax
import jax.numpy as jnp
from jax.experimental import pallas as pl
from jax.experimental.pallas import tpu as pltpu

EDA_DIM = 896      # self.eda_vector_dimension
H1 = 256
H2 = 128
NUM_CLASS = 2      # default num_class
NOUT_PAD = 128     # lane-dense padded output width (>= NUM_CLASS, multiple of 128)


def _mlp_kernel(x_ref, w1_ref, b1_ref, w2_ref, b2_ref, w3_ref, b3_ref, o_ref):
    x = x_ref[...]
    if x.dtype != jnp.bfloat16:          # static (trace-time) dtype check
        x = x.astype(jnp.bfloat16)
    # Layer 1: Linear(896 -> 256) + ReLU   (bf16 MXU matmul, f32 accumulate)
    h1 = jnp.dot(x, w1_ref[...], preferred_element_type=jnp.float32)
    h1 = jnp.maximum(h1 + b1_ref[...], 0.0)
    # Layer 2: Linear(256 -> 128) + ReLU
    h2 = jnp.dot(h1.astype(jnp.bfloat16), w2_ref[...],
                 preferred_element_type=jnp.float32)
    h2 = jnp.maximum(h2 + b2_ref[...], 0.0)
    # Layer 3: Linear(128 -> NOUT_PAD) — columns >= NUM_CLASS are zero-padded,
    # giving an MXU-sized N and an unmasked, lane-dense output store.
    out = jnp.dot(h2.astype(jnp.bfloat16), w3_ref[...],
                  preferred_element_type=jnp.float32)
    o_ref[...] = (out + b3_ref[...]).astype(o_ref.dtype)


def prepare_regression_params(w1, b1, w2, b2, w3, b3):
    """One-time parameter preparation (do NOT call per forward step).

    Casts weights to bf16 and zero-pads the final layer to a lane-dense
    (128-wide) output.  Biases stay f32 (added post-accumulation).
    """
    w1b = w1.astype(jnp.bfloat16)
    w2b = w2.astype(jnp.bfloat16)
    w3p = jnp.zeros((H2, NOUT_PAD), jnp.bfloat16).at[:, :NUM_CLASS].set(
        w3.astype(jnp.bfloat16))
    b1r = b1.reshape(1, H1).astype(jnp.float32)
    b2r = b2.reshape(1, H2).astype(jnp.float32)
    b3p = jnp.zeros((1, NOUT_PAD), jnp.float32).at[:, :NUM_CLASS].set(
        b3.reshape(1, NUM_CLASS))
    # TODO(synk): on v7x, w1 (78% of weight bytes) could be stored fp8-e4m3 and
    # fed to the MXU directly; skipped here for cross-generation portability.
    return w1b, b1r, w2b, b2r, w3p, b3p


def _pick_tile(B):
    """Batch tile: multiple of 8, large for roofline, >=2 grid steps when B>=256."""
    if B < 128:
        return max(8, -(-B // 8) * 8)
    if B < 256:
        return 128
    # Ensure at least 2 (parallel) grid steps so v7x's second TC is used,
    # while keeping the tile as large as possible (up to 512 rows).
    half = -(-B // 2)
    return min(512, -(-half // 8) * 8)


def regression_forward(x, w1b, b1r, w2b, b2r, w3p, b3p):
    """Pallas regression head.

    x: (B, 896) activations, f32 or bf16 (bf16 preferred: halves the x DMA).
    Weights/biases: output of `prepare_regression_params`.
    Returns (B, NUM_CLASS) float32.
    """
    B = x.shape[0]
    TM = _pick_tile(B)
    grid = (pl.cdiv(B, TM),)  # ragged last block handled by Pallas (no jnp.pad)

    const = lambda shape: pl.BlockSpec(shape, lambda i: (0, 0))  # VMEM-resident

    out_padded = pl.pallas_call(
        _mlp_kernel,
        out_shape=jax.ShapeDtypeStruct((B, NOUT_PAD), jnp.bfloat16),
        grid=grid,
        in_specs=[
            pl.BlockSpec((TM, EDA_DIM), lambda i: (i, 0)),   # activations: tiled over B
            const((EDA_DIM, H1)), const((1, H1)),            # weights/biases: constant
            const((H1, H2)), const((1, H2)),                 # index_map -> fetched once,
            const((H2, NOUT_PAD)), const((1, NOUT_PAD)),     # stay resident in VMEM
        ],
        out_specs=pl.BlockSpec((TM, NOUT_PAD), lambda i: (i, 0)),
        compiler_params=pltpu.CompilerParams(
            # Batch tiles are independent: shard the grid across both
            # TensorCores on v7x (no-op on single-TC v5e/v6e).
            dimension_semantics=("parallel",),
        ),
    )(x, w1b, b1r, w2b, b2r, w3p, b3p)

    return out_padded[:, :NUM_CLASS].astype(jnp.float32)


def init_linear(key, fan_in, fan_out):
    """Deterministic init mimicking torch.nn.Linear default (U[-1/sqrt(fan_in), +])."""
    kw, kb = jax.random.split(key)
    bound = 1.0 / math.sqrt(fan_in)
    w = jax.random.uniform(kw, (fan_in, fan_out), jnp.float32, -bound, bound)
    b = jax.random.uniform(kb, (1, fan_out), jnp.float32, -bound, bound)
    return w, b


def _bf16_reference(x, w1, b1, w2, b2, w3, b3):
    """Plain-JAX reference with the same bf16-weight / f32-accumulate / bf16-store math."""
    h1 = jnp.dot(x.astype(jnp.bfloat16), w1.astype(jnp.bfloat16),
                 preferred_element_type=jnp.float32)
    h1 = jnp.maximum(h1 + b1, 0.0)
    h2 = jnp.dot(h1.astype(jnp.bfloat16), w2.astype(jnp.bfloat16),
                 preferred_element_type=jnp.float32)
    h2 = jnp.maximum(h2 + b2, 0.0)
    out = jnp.dot(h2.astype(jnp.bfloat16), w3.astype(jnp.bfloat16),
                  preferred_element_type=jnp.float32)
    out = out + b3
    return out.astype(jnp.bfloat16).astype(jnp.float32)


def _f32_reference(x, w1, b1, w2, b2, w3, b3):
    """Full-precision reference of the PyTorch Regression head."""
    h1 = jnp.maximum(x @ w1 + b1, 0.0)
    h2 = jnp.maximum(h1 @ w2 + b2, 0.0)
    return h2 @ w3 + b3


if __name__ == "__main__":
    key = jax.random.PRNGKey(0)
    k_x, k1, k2, k3, k_x2 = jax.random.split(key, 5)

    w1, b1 = init_linear(k1, EDA_DIM, H1)
    w2, b2 = init_linear(k2, H1, H2)
    w3, b3 = init_linear(k3, H2, NUM_CLASS)

    # One-time parameter prep (bf16 cast + lane-dense padding of layer 3).
    params = prepare_regression_params(w1, b1, w2, b2, w3, b3)

    # Small batch: flattened eda feature vector (output of the undefined
    # ResNet1D feature extractor), shape (B, 896), f32 as in the PyTorch model.
    B = 8
    x = jax.random.normal(k_x, (B, EDA_DIM), jnp.float32)

    out = jax.block_until_ready(regression_forward(x, *params))
    assert out.shape == (B, NUM_CLASS)

    ref_bf16 = _bf16_reference(x, w1, b1, w2, b2, w3, b3)
    assert jnp.allclose(out, ref_bf16, atol=1e-2, rtol=1e-2)
    ref_f32 = _f32_reference(x, w1, b1, w2, b2, w3, b3)
    assert jnp.allclose(out, ref_f32, atol=5e-2, rtol=5e-2)

    # Ragged batch (non-multiple of TM=128): exercises the 2-step grid with a
    # partial last block (no wrapper-side padding).
    B2 = 136
    x2 = jax.random.normal(k_x2, (B2, EDA_DIM), jnp.float32)
    out2 = jax.block_until_ready(regression_forward(x2, *params))
    assert out2.shape == (B2, NUM_CLASS)
    assert jnp.allclose(out2, _bf16_reference(x2, w1, b1, w2, b2, w3, b3),
                        atol=1e-2, rtol=1e-2)

    # bf16 activation path (simulates a bf16-emitting feature extractor):
    # halves the x DMA, no in-kernel cast.
    out_bf = jax.block_until_ready(
        regression_forward(x.astype(jnp.bfloat16), *params))
    assert out_bf.shape == (B, NUM_CLASS)
    assert jnp.allclose(out_bf, ref_bf16, atol=1e-2, rtol=1e-2)

    print("KERNEL_OK")
</pallas_src>

<mosaic_0001>
module attributes {stable_mosaic.version = 11 : i64} {
  func.func @_mlp_kernel(%arg0: i32, %arg1: memref<8x896xf32, #tpu.memory_space<vmem>>, %arg2: memref<896x256xbf16, #tpu.memory_space<vmem>>, %arg3: memref<1x256xf32, #tpu.memory_space<vmem>>, %arg4: memref<256x128xbf16, #tpu.memory_space<vmem>>, %arg5: memref<1x128xf32, #tpu.memory_space<vmem>>, %arg6: memref<128x128xbf16, #tpu.memory_space<vmem>>, %arg7: memref<1x128xf32, #tpu.memory_space<vmem>>, %arg8: memref<8x128xbf16, #tpu.memory_space<vmem>>) attributes {dimension_semantics = [#tpu.dimension_semantics<parallel>], iteration_bounds = array<i64: 1>, scalar_prefetch = 0 : i64, scratch_operands = 0 : i64, tpu.core_type = #tpu.core_type<tc>, window_params = [{transform_indices = @transform_0, window_bounds = array<i64: 8, 896>}, {pipeline_mode = #tpu.pipeline_mode<synchronous>, transform_indices = @transform_1, window_bounds = array<i64: 896, 256>}, {pipeline_mode = #tpu.pipeline_mode<synchronous>, transform_indices = @transform_2, window_bounds = array<i64: 1, 256>}, {pipeline_mode = #tpu.pipeline_mode<synchronous>, transform_indices = @transform_3, window_bounds = array<i64: 256, 128>}, {pipeline_mode = #tpu.pipeline_mode<synchronous>, transform_indices = @transform_4, window_bounds = array<i64: 1, 128>}, {pipeline_mode = #tpu.pipeline_mode<synchronous>, transform_indices = @transform_5, window_bounds = array<i64: 128, 128>}, {pipeline_mode = #tpu.pipeline_mode<synchronous>, transform_indices = @transform_6, window_bounds = array<i64: 1, 128>}, {transform_indices = @transform_7, window_bounds = array<i64: 8, 128>}]} {
    %c0 = arith.constant 0 : index
    %c0_0 = arith.constant 0 : index
    %0 = vector.load %arg1[%c0, %c0_0] : memref<8x896xf32, #tpu.memory_space<vmem>>, vector<8x896xf32>
    %1 = arith.truncf %0 : vector<8x896xf32> to vector<8x896xbf16>
    %c0_1 = arith.constant 0 : index
    %c0_2 = arith.constant 0 : index
    %2 = vector.load %arg2[%c0_1, %c0_2] : memref<896x256xbf16, #tpu.memory_space<vmem>>, vector<896x256xbf16>
    %cst = arith.constant dense<0.000000e+00> : vector<8x256xf32>
    %3 = tpu.matmul %1, %2, %cst {dimension_numbers = #tpu.dot_dimension_numbers<[1], [0], [0], [1], [0, 0, 1, 1], [], []>} : vector<8x896xbf16>, vector<896x256xbf16>, vector<8x256xf32> -> vector<8x256xf32>
    %c0_3 = arith.constant 0 : index
    %c0_4 = arith.constant 0 : index
    %4 = vector.load %arg3[%c0_3, %c0_4] : memref<1x256xf32, #tpu.memory_space<vmem>>, vector<1x256xf32>
    %5 = vector.broadcast %4 : vector<1x256xf32> to vector<8x256xf32>
    %6 = arith.addf %3, %5 : vector<8x256xf32>
    %cst_5 = arith.constant 0.000000e+00 : f32
    %7 = vector.broadcast %cst_5 : f32 to vector<8x256xf32>
    %8 = arith.maximumf %6, %7 : vector<8x256xf32>
    %9 = arith.truncf %8 : vector<8x256xf32> to vector<8x256xbf16>
    %c0_6 = arith.constant 0 : index
    %c0_7 = arith.constant 0 : index
    %10 = vector.load %arg4[%c0_6, %c0_7] : memref<256x128xbf16, #tpu.memory_space<vmem>>, vector<256x128xbf16>
    %cst_8 = arith.constant dense<0.000000e+00> : vector<8x128xf32>
    %11 = tpu.matmul %9, %10, %cst_8 {dimension_numbers = #tpu.dot_dimension_numbers<[1], [0], [0], [1], [0, 0, 1, 1], [], []>} : vector<8x256xbf16>, vector<256x128xbf16>, vector<8x128xf32> -> vector<8x128xf32>
    %c0_9 = arith.constant 0 : index
    %c0_10 = arith.constant 0 : index
    %12 = vector.load %arg5[%c0_9, %c0_10] : memref<1x128xf32, #tpu.memory_space<vmem>>, vector<1x128xf32>
    %13 = vector.broadcast %12 : vector<1x128xf32> to vector<8x128xf32>
    %14 = arith.addf %11, %13 : vector<8x128xf32>
    %cst_11 = arith.constant 0.000000e+00 : f32
    %15 = vector.broadcast %cst_11 : f32 to vector<8x128xf32>
    %16 = arith.maximumf %14, %15 : vector<8x128xf32>
    %17 = arith.truncf %16 : vector<8x128xf32> to vector<8x128xbf16>
    %c0_12 = arith.constant 0 : index
    %c0_13 = arith.constant 0 : index
    %18 = vector.load %arg6[%c0_12, %c0_13] : memref<128x128xbf16, #tpu.memory_space<vmem>>, vector<128x128xbf16>
    %cst_14 = arith.constant dense<0.000000e+00> : vector<8x128xf32>
    %19 = tpu.matmul %17, %18, %cst_14 {dimension_numbers = #tpu.dot_dimension_numbers<[1], [0], [0], [1], [0, 0, 1, 1], [], []>} : vector<8x128xbf16>, vector<128x128xbf16>, vector<8x128xf32> -> vector<8x128xf32>
    %c0_15 = arith.constant 0 : index
    %c0_16 = arith.constant 0 : index
    %20 = vector.load %arg7[%c0_15, %c0_16] : memref<1x128xf32, #tpu.memory_space<vmem>>, vector<1x128xf32>
    %21 = vector.broadcast %20 : vector<1x128xf32> to vector<8x128xf32>
    %22 = arith.addf %19, %21 : vector<8x128xf32>
    %23 = arith.truncf %22 : vector<8x128xf32> to vector<8x128xbf16>
    %c0_17 = arith.constant 0 : index
    %c0_18 = arith.constant 0 : index
    %24 = vector.load %arg8[%c0_17, %c0_18] : memref<8x128xbf16, #tpu.memory_space<vmem>>, vector<8x128xbf16>
    tpu.vector_store %arg8[%c0_17, %c0_18], %23 {strides = array<i32>} : memref<8x128xbf16, #tpu.memory_space<vmem>>, vector<8x128xbf16>,
    return
  }
  func.func @transform_0(%arg0: i32) -> (i32, i32) {
    %c0_i32 = arith.constant 0 : i32
    %c0_i32_0 = arith.constant 0 : i32
    return %arg0, %c0_i32 : i32, i32
  }
  func.func @transform_1(%arg0: i32) -> (i32, i32) {
    %c0_i32 = arith.constant 0 : i32
    %c0_i32_0 = arith.constant 0 : i32
    %c0_i32_1 = arith.constant 0 : i32
    return %c0_i32, %c0_i32_0 : i32, i32
  }
  func.func @transform_2(%arg0: i32) -> (i32, i32) {
    %c0_i32 = arith.constant 0 : i32
    %c0_i32_0 = arith.constant 0 : i32
    %c0_i32_1 = arith.constant 0 : i32
    return %c0_i32, %c0_i32_0 : i32, i32
  }
  func.func @transform_3(%arg0: i32) -> (i32, i32) {
    %c0_i32 = arith.constant 0 : i32
    %c0_i32_0 = arith.constant 0 : i32
    %c0_i32_1 = arith.constant 0 : i32
    return %c0_i32, %c0_i32_0 : i32, i32
  }
  func.func @transform_4(%arg0: i32) -> (i32, i32) {
    %c0_i32 = arith.constant 0 : i32
    %c0_i32_0 = arith.constant 0 : i32
    %c0_i32_1 = arith.constant 0 : i32
    return %c0_i32, %c0_i32_0 : i32, i32
  }
  func.func @transform_5(%arg0: i32) -> (i32, i32) {
    %c0_i32 = arith.constant 0 : i32
    %c0_i32_0 = arith.constant 0 : i32
    %c0_i32_1 = arith.constant 0 : i32
    return %c0_i32, %c0_i32_0 : i32, i32
  }
  func.func @transform_6(%arg0: i32) -> (i32, i32) {
    %c0_i32 = arith.constant 0 : i32
    %c0_i32_0 = arith.constant 0 : i32
    %c0_i32_1 = arith.constant 0 : i32
    return %c0_i32, %c0_i32_0 : i32, i32
  }
  func.func @transform_7(%arg0: i32) -> (i32, i32) {
    %c0_i32 = arith.constant 0 : i32
    %c0_i32_0 = arith.constant 0 : i32
    return %arg0, %c0_i32 : i32, i32
  }
}

</mosaic_0001>

<bundles_post_ra>
// kernel: tpu_custom_call.1
= control target key start
LH: loop header
LB: loop body
LE: loop exit
PB: predicated region body
PF: predicated region fallthrough
CT: control target
= control target key end

     0   :  { %12 = vsyncpa [#allocation3], 0  ;;  %s1898_s0 = inlined_call_operand.hbm [shape: f32[8,896], index: 0, kind: input, shape index: {}]   ;;  %s1899_s1 = inlined_call_operand.hbm [shape: bf16[896,256], index: 1, kind: input, shape index: {}]   ;;  %s1900_s2 = inlined_call_operand.vmem [shape: f32[1,256], index: 2, kind: input, shape index: {}]   ;;  %s1901_s3 = inlined_call_operand.hbm [shape: bf16[256,128], index: 3, kind: input, shape index: {}]   ;;  %s1902_s4 = inlined_call_operand.vmem [shape: f32[1,128], index: 4, kind: input, shape index: {}]   ;;  %s1903_s5 = inlined_call_operand.hbm [shape: bf16[128,128], index: 5, kind: input, shape index: {}]   ;;  %s1904_s6 = inlined_call_operand.vmem [shape: f32[1,128], index: 6, kind: input, shape index: {}]   ;;  %s1905_s7 = inlined_call_operand.hbm [shape: bf16[8,128], index: 7, kind: output, shape index: {}]  }
   0x1   :  { %13 = vsyncpa [#allocation6], 0 }
   0x2   :  { %14 = vsyncpa [#allocation9], 0 }
   0x3   :  { %15 = vsyncpa [#allocation4], 0  ;;  %s1777_s24 = smov [#allocation5]   ;;  %s1659_s28 = scalar_lea.hbm %s1899_s1, 14336 }
   0x4   :  { %s31_s25 = sshll.u32 %s1777_s24, 4  ;;  %p1660_p0 = scmp.ne.s32.totalorder %s1899_s1, %s1659_s28  ;;  %s32_s25 = int_to_ptr.vmem [resolvable:$true] %s31_s25 }
   0x5   :  { %p1663_p1 = scmp.lt.u32.totalorder %s1659_s28, %s1899_s1 }
   0x7   :  { %p1665_p2 = pnand %p1663_p1, %p1660_p0 }
   0x9   :  { %1668 = shalt.err (!%p1665_p2)
}
   0xa   :  { %s1669_s10 = scalar_lea.vmem %s32_s25, 14336  ;;  %p1674_p4 = scmp.lt.s32.totalorder %s32_s25, %s32_s25 }
   0xb   :  { %p1670_p3 = scmp.ne.s32.totalorder %s32_s25, %s1669_s10  ;;  %p1675_p5 = scmp.lt.s32.totalorder %s1669_s10, %s1669_s10 }
   0xd   :  { %p1676_p6 = por %p1675_p5, %p1674_p4 }
   0xf   :  { %p1677_p7 = pnand %p1676_p6, %p1670_p3 }
  0x11   :  { %1680 = shalt.err (!%p1677_p7)
}
  0x12   :  { %s1778_s11 = smov 128   ;;  %s1779_s12 = smov 8  }
  0x13   :  { %37 = dma.hbm_to_vmem [thread:$0]  %s1899_s1, 14336, %s32_s25, [#allocation6], %s1778_s11, %s1778_s11, %s1779_s12  }
  0x14   :  { %s1780_s15 = smov [#allocation2]   ;;  %s1781_s17 = smov [#allocation7]  }
  0x15   :  { %s22_s16 = sshll.u32 %s1780_s15, 4  ;;  %s45_s18 = sshll.u32 %s1781_s17, 4  ;;  %s23_s16 = int_to_ptr.vmem [resolvable:$true] %s22_s16  ;;  %s46_s18 = int_to_ptr.vmem [resolvable:$true] %s45_s18 }
  0x16   :  { %s1681_s21 = scalar_lea.hbm %s1898_s0, 896 }
  0x17   :  { %p1682_p8 = scmp.ne.s32.totalorder %s1898_s0, %s1681_s21  ;;  %p1685_p9 = scmp.lt.u32.totalorder %s1681_s21, %s1898_s0 }
  0x19   :  { %p1687_p10 = pnand %p1685_p9, %p1682_p8 }
  0x1b   :  { %1690 = shalt.err (!%p1687_p10)
}
  0x1c   :  { %s1691_s1 = scalar_lea.vmem %s23_s16, 896  ;;  %p1696_p12 = scmp.lt.s32.totalorder %s23_s16, %s23_s16 }
  0x1d   :  { %p1692_p11 = scmp.ne.s32.totalorder %s23_s16, %s1691_s1  ;;  %p1697_p13 = scmp.lt.s32.totalorder %s1691_s1, %s1691_s1 }
  0x1f   :  { %p1698_p0 = por %p1697_p13, %p1696_p12 }
  0x21   :  { %p1699_p1 = pnand %p1698_p0, %p1692_p11 }
  0x23   :  { %1702 = shalt.err (!%p1699_p1)
}
  0x24   :  { %25 = dma.hbm_to_vmem [thread:$0]  %s1898_s0, 896, %s23_s16, [#allocation3]  }
  0x25   :  { %s1703_s30 = scalar_lea.hbm %s1901_s3, 2048 }
  0x26   :  { %p1704_p2 = scmp.ne.s32.totalorder %s1901_s3, %s1703_s30  ;;  %p1707_p3 = scmp.lt.u32.totalorder %s1703_s30, %s1901_s3 }
  0x28   :  { %p1709_p4 = pnand %p1707_p3, %p1704_p2 }
  0x2a   :  { %1712 = shalt.err (!%p1709_p4)
}
  0x2b   :  { %s1713_s12 = scalar_lea.vmem %s46_s18, 2048  ;;  %p1718_p6 = scmp.lt.s32.totalorder %s46_s18, %s46_s18 }
  0x2c   :  { %p1714_p5 = scmp.ne.s32.totalorder %s46_s18, %s1713_s12  ;;  %p1719_p7 = scmp.lt.s32.totalorder %s1713_s12, %s1713_s12 }
  0x2e   :  { %p1720_p8 = por %p1719_p7, %p1718_p6 }
  0x30   :  { %p1721_p9 = pnand %p1720_p8, %p1714_p5 }
  0x32   :  { %1724 = shalt.err (!%p1721_p9)
}
  0x33   :  { %s1782_s0 = smov 64   ;;  %s1783_s13 = smov 4  }
  0x34   :  { %51 = dma.hbm_to_vmem [thread:$0]  %s1901_s3, 2048, %s46_s18, [#allocation6], %s1782_s0, %s1782_s0, %s1783_s13  }
  0x35   :  { %s1784_s16 = smov [#allocation8]   ;;  %s1725_s21 = scalar_lea.hbm %s1903_s5, 1024 }
  0x36   :  { %s59_s17 = sshll.u32 %s1784_s16, 4  ;;  %p1726_p10 = scmp.ne.s32.totalorder %s1903_s5, %s1725_s21  ;;  %s60_s17 = int_to_ptr.vmem [resolvable:$true] %s59_s17 }
  0x37   :  { %p1729_p11 = scmp.lt.u32.totalorder %s1725_s21, %s1903_s5 }
  0x39   :  { %p1731_p12 = pnand %p1729_p11, %p1726_p10 }
  0x3b   :  { %1734 = shalt.err (!%p1731_p12)
}
  0x3c   :  { %s1735_s1 = scalar_lea.vmem %s60_s17, 1024  ;;  %p1740_p0 = scmp.lt.s32.totalorder %s60_s17, %s60_s17 }
  0x3d   :  { %p1736_p13 = scmp.ne.s32.totalorder %s60_s17, %s1735_s1  ;;  %p1741_p1 = scmp.lt.s32.totalorder %s1735_s1, %s1735_s1 }
  0x3f   :  { %p1742_p2 = por %p1741_p1, %p1740_p0 }
  0x41   :  { %p1743_p3 = pnand %p1742_p2, %p1736_p13 }
  0x43   :  { %1746 = shalt.err (!%p1743_p3)
}
  0x44   :  { %65 = dma.hbm_to_vmem [thread:$0]  %s1903_s5, 1024, %s60_s17, [#allocation9], %s1782_s0, %s1782_s0, %s1783_s13  }
  0x45   :  { %1769 = dma.done.wait [#allocation3], 896  }
  0x46   :  { %1770 = vsyncadd [#allocation3], 4294966400 }
  0x47   :  { %1771 = dma.done.wait [#allocation6], 16384  }
  0x48   :  { %1772 = vsyncadd [#allocation6], 4294950912 }
  0x49   :  { %1773 = dma.done.wait [#allocation9], 1024  }
  0x4a   :  { %1774 = vsyncadd [#allocation9], 4294966272  ;;  %v1467_v0 = vld [vmem:[#allocation5 + $0x104] ss:$8 sps:$4 sm:$0xff]   ;;  %v1469_v1 = vld [vmem:[#allocation5 + $0x100] ss:$8 sps:$4 sm:$0xff]  }
  0x4b   :  { %820 = vmatprep.subr.bf16.mxu0 %v1467_v0  ;;  %v1470_v2 = vld [vmem:[#allocation5 + $0x114] ss:$8 sps:$4 sm:$0xff]   ;;  %v1472_v3 = vld [vmem:[#allocation5 + $0x110] ss:$8 sps:$4 sm:$0xff]   ;;  %v1473_v4 = vld [vmem:[#allocation5 + $0x124] ss:$8 sps:$4 sm:$0xff]  }
  0x4c   :  { %821 = vmatpush1.bf16.msra.mxu0 %v1469_v1  ;;  %v1475_v5 = vld [vmem:[#allocation5 + $0x120] ss:$8 sps:$4 sm:$0xff]   ;;  %v1476_v6 = vld [vmem:[#allocation5 + $0x134] ss:$8 sps:$4 sm:$0xff]   ;;  %v1478_v7 = vld [vmem:[#allocation5 + $0x130] ss:$8 sps:$4 sm:$0xff]  }
  0x4d   :  { %822 = vmatprep.subr.bf16.mxu0 %v1470_v2  ;;  %v1479_v8 = vld [vmem:[#allocation5 + $0x144] ss:$8 sps:$4 sm:$0xff]   ;;  %v1481_v9 = vld [vmem:[#allocation5 + $0x140] ss:$8 sps:$4 sm:$0xff]   ;;  %v1482_v10 = vld [vmem:[#allocation5 + $0x154] ss:$8 sps:$4 sm:$0xff]  }
  0x4e   :  { %v1484_v11 = vld [vmem:[#allocation5 + $0x150] ss:$8 sps:$4 sm:$0xff]   ;;  %v1485_v12 = vld [vmem:[#allocation5 + $0x164] ss:$8 sps:$4 sm:$0xff]   ;;  %v1487_v15 = vld [vmem:[#allocation5 + $0x160] ss:$8 sps:$4 sm:$0xff]  }
  0x4f   :  { %v84_v13 = vld [vmem:[#allocation2 + $0x18] sm:$0xff]  ;;  %v1488_v16 = vld [vmem:[#allocation5 + $0x174] ss:$8 sps:$4 sm:$0xff]   ;;  %v1490_v17 = vld [vmem:[#allocation5 + $0x170] ss:$8 sps:$4 sm:$0xff]   ;;  %vm1787_vm0 = vmmov 0  }
  0x50   :  { %823 = vmatpush1.bf16.msra.mxu0 %v1472_v3  ;;  %v91_v14 = vpack.c.bf16 %v84_v13, %v84_v13  ;;  %v1491_v18 = vld [vmem:[#allocation5 + $0x184] ss:$8 sps:$4 sm:$0xff]   ;;  %v1493_v19 = vld [vmem:[#allocation5 + $0x180] ss:$8 sps:$4 sm:$0xff]   ;;  %v1494_v20 = vld [vmem:[#allocation5 + $0x194] ss:$8 sps:$4 sm:$0xff]  }
  0x51   :  { %824 = vmatprep.subr.bf16.mxu0 %v1473_v4  ;;  %v1536_v21 = vld [vmem:[#allocation5 + $0x4] ss:$8 sps:$4 sm:$0xff]   ;;  %v1538_v22 = vld [vmem:[#allocation5] ss:$8 sps:$4 sm:$0xff]   ;;  %v1496_v23 = vld [vmem:[#allocation5 + $0x190] ss:$8 sps:$4 sm:$0xff]  }
  0x52   :  { %852 = vmatprep.mubr.bf16.mxu0 %v91_v14  ;;  %779 = vmatprep.subr.bf16.mxu1 %v1536_v21  ;;  %v1542_v24 = vld [vmem:[#allocation5 + $0x14] ss:$8 sps:$4 sm:$0xff]   ;;  %v1544_v25 = vld [vmem:[#allocation5 + $0x10] ss:$8 sps:$4 sm:$0xff]   ;;  %v1497_v26 = vld [vmem:[#allocation5 + $0x1a4] ss:$8 sps:$4 sm:$0xff]  }
  0x53   :  { %780 = vmatpush1.bf16.msra.mxu1 %v1538_v22  ;;  %v1548_v27 = vld [vmem:[#allocation5 + $0x24] ss:$8 sps:$4 sm:$0xff]   ;;  %v1499_v28 = vld [vmem:[#allocation5 + $0x1a0] ss:$8 sps:$4 sm:$0xff]   ;;  %v1500_v30 = vld [vmem:[#allocation5 + $0x1b4] ss:$8 sps:$4 sm:$0xff]  }
  0x54   :  { %825 = vmatpush1.bf16.msra.mxu0 %v1475_v5  ;;  %781 = vmatprep.subr.bf16.mxu1 %v1542_v24  ;;  %v1550_v29 = vld [vmem:[#allocation5 + $0x20] ss:$8 sps:$4 sm:$0xff]   ;;  %v1554_v31 = vld [vmem:[#allocation5 + $0x34] ss:$8 sps:$4 sm:$0xff]   ;;  %v1502_v32 = vld [vmem:[#allocation5 + $0x1b0] ss:$8 sps:$4 sm:$0xff]  }
  0x55   :  { %826 = vmatprep.subr.bf16.mxu0 %v1476_v6  ;;  %v1556_v33 = vld [vmem:[#allocation5 + $0x30] ss:$8 sps:$4 sm:$0xff]   ;;  %v1503_v34 = vld [vmem:[#allocation5 + $0x1c4] ss:$8 sps:$4 sm:$0xff]   ;;  %v1505_v36 = vld [vmem:[#allocation5 + $0x1c0] ss:$8 sps:$4 sm:$0xff]  }
  0x56   :  { %v1560_v35 = vld [vmem:[#allocation5 + $0x44] ss:$8 sps:$4 sm:$0xff]   ;;  %v1562_v37 = vld [vmem:[#allocation5 + $0x40] ss:$8 sps:$4 sm:$0xff]   ;;  %v1506_v38 = vld [vmem:[#allocation5 + $0x1d4] ss:$8 sps:$4 sm:$0xff]  }
  0x57   :  { %782 = vmatpush1.bf16.msra.mxu1 %v1544_v25  ;;  %v1566_v39 = vld [vmem:[#allocation5 + $0x54] ss:$8 sps:$4 sm:$0xff]   ;;  %v1508_v40 = vld [vmem:[#allocation5 + $0x1d0] ss:$8 sps:$4 sm:$0xff]   ;;  %v1509_v42 = vld [vmem:[#allocation5 + $0x1e4] ss:$8 sps:$4 sm:$0xff]  }
  0x58   :  { %827 = vmatpush1.bf16.msra.mxu0 %v1478_v7  ;;  %783 = vmatprep.subr.bf16.mxu1 %v1548_v27  ;;  %v1568_v41 = vld [vmem:[#allocation5 + $0x50] ss:$8 sps:$4 sm:$0xff]   ;;  %v1572_v43 = vld [vmem:[#allocation5 + $0x64] ss:$8 sps:$4 sm:$0xff]   ;;  %v1511_v44 = vld [vmem:[#allocation5 + $0x1e0] ss:$8 sps:$4 sm:$0xff]  }
  0x59   :  { %828 = vmatprep.subr.bf16.mxu0 %v1479_v8  ;;  %v1574_v45 = vld [vmem:[#allocation5 + $0x60] ss:$8 sps:$4 sm:$0xff]   ;;  %v1512_v46 = vld [vmem:[#allocation5 + $0x1f4] ss:$8 sps:$4 sm:$0xff]   ;;  %v1514_v48 = vld [vmem:[#allocation5 + $0x1f0] ss:$8 sps:$4 sm:$0xff]  }
  0x5a   :  { %v1578_v47 = vld [vmem:[#allocation5 + $0x74] ss:$8 sps:$4 sm:$0xff]   ;;  %v1517_v49 = vld [vmem:[#allocation5 + $0x204] ss:$8 sps:$4 sm:$0xff]   ;;  %v1580_v51 = vld [vmem:[#allocation5 + $0x70] ss:$8 sps:$4 sm:$0xff]  }
  0x5b   :  { %784 = vmatpush1.bf16.msra.mxu1 %v1550_v29  ;;  %v83_v50 = vld [vmem:[#allocation2 + $0x10] sm:$0xff]  ;;  %v1584_v52 = vld [vmem:[#allocation5 + $0x84] ss:$8 sps:$4 sm:$0xff]   ;;  %v1515_v53 = vld [vmem:[#allocation5 + $0x200] ss:$8 sps:$4 sm:$0xff]   ;;  %s1788_s30 = smov [#allocation10]  }
  0x5c   :  { %829 = vmatpush1.bf16.msra.mxu0 %v1481_v9  ;;  %785 = vmatprep.subr.bf16.mxu1 %v1554_v31  ;;  %v90_v54 = vpack.c.bf16 %v83_v50, %v83_v50  ;;  %v86_v55 = vld [vmem:[#allocation2 + $0x28] sm:$0xff]  ;;  %v1586_v57 = vld [vmem:[#allocation5 + $0x80] ss:$8 sps:$4 sm:$0xff]   ;;  %v1523_v61 = vld [vmem:[#allocation5 + $0x224] ss:$8 sps:$4 sm:$0xff]   ;;  %s1243_s8 = sshll.u32 %s1788_s30, 4  ;;  %s1244_s8 = int_to_ptr.vmem [resolvable:$true] %s1243_s8 }
  0x5d   :  { %830 = vmatprep.subr.bf16.mxu0 %v1482_v10  ;;  %v1520_v56 = vld [vmem:[#allocation5 + $0x214] ss:$8 sps:$4 sm:$0xff]   ;;  %v93_v59 = vpack.c.bf16 %v86_v55, %v86_v55  ;;  %v1518_v60 = vld [vmem:[#allocation5 + $0x210] ss:$8 sps:$4 sm:$0xff]   ;;  %v1596_v63 = vld [vmem:[#allocation5 + $0xa4] ss:$8 sps:$4 sm:$0xff]   ;;  %p1752_p5 = scmp.lt.s32.totalorder %s1244_s8, %s1244_s8 }
  0x5e   :  { %v1590_v58 = vld [vmem:[#allocation5 + $0x94] ss:$8 sps:$4 sm:$0xff]   ;;  %v1592_v62 = vld [vmem:[#allocation5 + $0x90] ss:$8 sps:$4 sm:$0xff]   ;;  %v1521_v0 = vld [vmem:[#allocation5 + $0x220] ss:$8 sps:$4 sm:$0xff]  }
  0x5f   :  { %786 = vmatpush1.bf16.msra.mxu1 %v1556_v33  ;;  %v1526_v1 = vld [vmem:[#allocation5 + $0x234] ss:$8 sps:$4 sm:$0xff]   ;;  %v1598_v2 = vld [vmem:[#allocation5 + $0xa0] ss:$8 sps:$4 sm:$0xff]   ;;  %v1524_v4 = vld [vmem:[#allocation5 + $0x230] ss:$8 sps:$4 sm:$0xff]  }
  0x60   :  { %831 = vmatpush1.bf16.msra.mxu0 %v1484_v11  ;;  %787 = vmatprep.subr.bf16.mxu1 %v1560_v35  ;;  %v1602_v3 = vld [vmem:[#allocation5 + $0xb4] ss:$8 sps:$4 sm:$0xff]   ;;  %v1604_v6 = vld [vmem:[#allocation5 + $0xb0] ss:$8 sps:$4 sm:$0xff]   ;;  %v1529_v8 = vld [vmem:[#allocation5 + $0x244] ss:$8 sps:$4 sm:$0xff]  }
  0x61   :  { %832 = vmatprep.subr.bf16.mxu0 %v1485_v12  ;;  %v82_v5 = vld [vmem:[#allocation2 + $0x8] sm:$0xff]  ;;  %v1608_v9 = vld [vmem:[#allocation5 + $0xc4] ss:$8 sps:$4 sm:$0xff]   ;;  %v1527_v10 = vld [vmem:[#allocation5 + $0x240] ss:$8 sps:$4 sm:$0xff]  }
  0x62   :  { %v89_v7 = vpack.c.bf16 %v82_v5, %v82_v5  ;;  %v1532_v11 = vld [vmem:[#allocation5 + $0x254] ss:$8 sps:$4 sm:$0xff]   ;;  %v1610_v12 = vld [vmem:[#allocation5 + $0xc0] ss:$8 sps:$4 sm:$0xff]   ;;  %v1530_v14 = vld [vmem:[#allocation5 + $0x250] ss:$8 sps:$4 sm:$0xff]  }
  0x63   :  { %788 = vmatpush1.bf16.msra.mxu1 %v1562_v37  ;;  %v1614_v13 = vld [vmem:[#allocation5 + $0xd4] ss:$8 sps:$4 sm:$0xff]   ;;  %v1539_v22 = vld [vmem:[#allocation5 + $0x270] ss:$8 sps:$4 sm:$0xff]   ;;  %v81_v24 = vld [vmem:[#allocation2] sm:$0xff] }
  0x64   :  { %833 = vmatpush1.bf16.msra.mxu0 %v1487_v15  ;;  %789 = vmatprep.subr.bf16.mxu1 %v1566_v39  ;;  %v1535_v15 = vld [vmem:[#allocation5 + $0x264] ss:$8 sps:$4 sm:$0xff]   ;;  %v1626_v21 = vld [vmem:[#allocation5 + $0xf4] ss:$8 sps:$4 sm:$0xff]   ;;  %v1545_v27 = vld [vmem:[#allocation5 + $0x280] ss:$8 sps:$4 sm:$0xff]  }
  0x65   :  { %834 = vmatprep.subr.bf16.mxu0 %v1488_v16  ;;  %811 = vmatprep.mubr.bf16.mxu1 %v89_v7  ;;  %v1616_v16 = vld [vmem:[#allocation5 + $0xd0] ss:$8 sps:$4 sm:$0xff]   ;;  %v1547_v25 = vld [vmem:[#allocation5 + $0x284] ss:$8 sps:$4 sm:$0xff]   ;;  %v1553_v29 = vld [vmem:[#allocation5 + $0x294] ss:$8 sps:$4 sm:$0xff]  }
  0x66   :  { %v1637_v31 = vld [vmem:[#allocation7 + $0x48] sm:$0xff]   ;;  %v1639_v35 = vld [vmem:[#allocation7 + $0x50] sm:$0xff]   ;;  %v1641_v39 = vld [vmem:[#allocation7 + $0x58] sm:$0xff]  }
  0x67   :  { %790 = vmatpush1.bf16.msra.mxu1 %v1568_v41  ;;  %v1638_v33 = vld [vmem:[#allocation7 + $0x8] sm:$0xff]   ;;  %v1640_v37 = vld [vmem:[#allocation7 + $0x10] sm:$0xff]   ;;  %v1642_v41 = vld [vmem:[#allocation7 + $0x18] sm:$0xff]  }
  0x68   :  { %835 = vmatpush1.bf16.msra.mxu0 %v1490_v17  ;;  %791 = vmatprep.subr.bf16.mxu1 %v1572_v43  ;;  %v1620_v17 = vld [vmem:[#allocation5 + $0xe4] ss:$8 sps:$4 sm:$0xff]   ;;  %v1589_v50 = vld [vmem:[#allocation5 + $0x2f4] ss:$8 sps:$4 sm:$0xff]   ;;  %v1593_v55 = vld [vmem:[#allocation5 + $0x300] ss:$8 sps:$4 sm:$0xff]  }
  0x69   :  { %836 = vmatprep.subr.bf16.mxu0 %v1491_v18  ;;  %v1533_v18 = vld [vmem:[#allocation5 + $0x260] ss:$8 sps:$4 sm:$0xff]   ;;  %v1634_v5 = vld [vmem:[#allocation5 + $0x374] ss:$8 sps:$4 sm:$0xff]  }
  0x6a   :  { %v1643_v43 = vld [vmem:[#allocation7 + $0x60] sm:$0xff]   ;;  %v87_v7 = vld [vmem:[#allocation2 + $0x30] sm:$0xff] }
  0x6b   :  { %792 = vmatpush1.bf16.msra.mxu1 %v1574_v45  ;;  %v1644_v45 = vld [vmem:[#allocation7 + $0x20] sm:$0xff]  }
  0x6c   :  { %837 = vmatpush1.bf16.msra.mxu0 %v1493_v19  ;;  %793 = vmatprep.subr.bf16.mxu1 %v1578_v47  ;;  %v1541_v19 = vld [vmem:[#allocation5 + $0x274] ss:$8 sps:$4 sm:$0xff]   ;;  %v1575_v47 = vld [vmem:[#allocation5 + $0x2d0] ss:$8 sps:$4 sm:$0xff]  }
  0x6d   :  { %838 = vmatprep.subr.bf16.mxu0 %v1494_v20  ;;  %v1622_v20 = vld [vmem:[#allocation5 + $0xe0] ss:$8 sps:$4 sm:$0xff]  }
  0x6f   :  { %794 = vmatpush1.bf16.msra.mxu1 %v1580_v51  ;;  %v1587_v51 = vld [vmem:[#allocation5 + $0x2f0] ss:$8 sps:$4 sm:$0xff]  }
  0x70   :  { %839 = vmatpush1.bf16.msra.mxu0 %v1496_v23  ;;  %795 = vmatprep.subr.bf16.mxu1 %v1584_v52  ;;  %v1628_v23 = vld [vmem:[#allocation5 + $0xf0] ss:$8 sps:$4 sm:$0xff]   ;;  %v85_v52 = vld [vmem:[#allocation2 + $0x20] sm:$0xff] }
  0x71   :  { %840 = vmatprep.subr.bf16.mxu0 %v1497_v26  ;;  %v1635_v26 = vld [vmem:[#allocation7 + $0x40] sm:$0xff]  }
  0x73   :  { %796 = vmatpush1.bf16.msra.mxu1 %v1586_v57  ;;  %v1599_v57 = vld [vmem:[#allocation5 + $0x310] ss:$8 sps:$4 sm:$0xff]  }
  0x74   :  { %841 = vmatpush1.bf16.msra.mxu0 %v1499_v28  ;;  %797 = vmatprep.subr.bf16.mxu1 %v1590_v58  ;;  %v1636_v28 = vld [vmem:[#allocation7] sm:$0xff]   ;;  %v1785_v58 = vmov 0  }
  0x75   :  { %842 = vmatprep.subr.bf16.mxu0 %v1500_v30  ;;  %v88_v30 = vpack.c.bf16 %v81_v24, %v81_v24 }
  0x77   :  { %798 = vmatpush1.bf16.msra.mxu1 %v1592_v62  ;;  %v1611_v62 = vld [vmem:[#allocation5 + $0x330] ss:$8 sps:$4 sm:$0xff]  }
  0x78   :  { %843 = vmatpush1.bf16.msra.mxu0 %v1502_v32  ;;  %799 = vmatprep.subr.bf16.mxu1 %v1596_v63  ;;  %v1551_v32 = vld [vmem:[#allocation5 + $0x290] ss:$8 sps:$4 sm:$0xff]   ;;  %v1619_v63 = vld [vmem:[#allocation5 + $0x344] ss:$8 sps:$4 sm:$0xff]  }
  0x79   :  { %844 = vmatprep.subr.bf16.mxu0 %v1503_v34  ;;  %v1559_v34 = vld [vmem:[#allocation5 + $0x2a4] ss:$8 sps:$4 sm:$0xff]  }
  0x7b   :  { %800 = vmatpush1.bf16.msra.mxu1 %v1598_v2  ;;  %v1623_v2 = vld [vmem:[#allocation5 + $0x350] ss:$8 sps:$4 sm:$0xff]  }
  0x7c   :  { %845 = vmatpush1.bf16.msra.mxu0 %v1505_v36  ;;  %801 = vmatprep.subr.bf16.mxu1 %v1602_v3  ;;  %v1557_v36 = vld [vmem:[#allocation5 + $0x2a0] ss:$8 sps:$4 sm:$0xff]   ;;  %v1631_v3 = vld [vmem:[#allocation5 + $0x364] ss:$8 sps:$4 sm:$0xff]  }
  0x7d   :  { %846 = vmatprep.subr.bf16.mxu0 %v1506_v38  ;;  %v1565_v38 = vld [vmem:[#allocation5 + $0x2b4] ss:$8 sps:$4 sm:$0xff]  }
  0x7f   :  { %802 = vmatpush1.bf16.msra.mxu1 %v1604_v6  ;;  %v1632_v6 = vld [vmem:[#allocation5 + $0x370] ss:$8 sps:$4 sm:$0xff]  }
  0x80   :  { %847 = vmatpush1.bf16.msra.mxu0 %v1508_v40  ;;  %803 = vmatprep.subr.bf16.mxu1 %v1608_v9  ;;  %v1563_v40 = vld [vmem:[#allocation5 + $0x2b0] ss:$8 sps:$4 sm:$0xff]   ;;  %v1645_v9 = vld [vmem:[#allocation7 + $0x68] sm:$0xff]  }
  0x81   :  { %848 = vmatprep.subr.bf16.mxu0 %v1509_v42  ;;  %v1571_v42 = vld [vmem:[#allocation5 + $0x2c4] ss:$8 sps:$4 sm:$0xff]  }
  0x83   :  { %804 = vmatpush1.bf16.msra.mxu1 %v1610_v12  ;;  %v1648_v12 = vld [vmem:[#allocation7 + $0x30] sm:$0xff]  }
  0x84   :  { %849 = vmatpush1.bf16.msra.mxu0 %v1511_v44  ;;  %805 = vmatprep.subr.bf16.mxu1 %v1614_v13  ;;  %v1569_v44 = vld [vmem:[#allocation5 + $0x2c0] ss:$8 sps:$4 sm:$0xff]   ;;  %v1649_v13 = vld [vmem:[#allocation7 + $0x78] sm:$0xff]  }
  0x85   :  { %850 = vmatprep.subr.bf16.mxu0 %v1512_v46  ;;  %v1577_v46 = vld [vmem:[#allocation5 + $0x2d4] ss:$8 sps:$4 sm:$0xff]  }
  0x87   :  { %806 = vmatpush1.bf16.msra.mxu1 %v1616_v16 }
  0x88   :  { %851 = vmatpush1.bf16.msra.mxu0 %v1514_v48  ;;  %807 = vmatprep.subr.bf16.mxu1 %v1620_v17  ;;  %v1583_v48 = vld [vmem:[#allocation5 + $0x2e4] ss:$8 sps:$4 sm:$0xff]  }
  0x89   :  { %861 = vmatprep.subr.bf16.mxu0 %v1517_v49  ;;  %v1581_v49 = vld [vmem:[#allocation5 + $0x2e0] ss:$8 sps:$4 sm:$0xff]  }
  0x8b   :  { %853 = vmatmul.mubr.bf16.vlgmr.msra.gmra.mrb[0].mxu0 %v90_v54  ;;  %808 = vmatpush1.bf16.msra.mxu1 %v1622_v20  ;;  %v92_v54 = vpack.c.bf16 %v85_v52, %v85_v52  ;;  %v209_v20 = vlaneseq }
  0x8c   :  { %862 = vmatpush1.bf16.msra.mxu0 %v1515_v53  ;;  %893 = vmatprep.mubr.bf16.mxu0 %v93_v59  ;;  %v1595_v53 = vld [vmem:[#allocation5 + $0x304] ss:$8 sps:$4 sm:$0xff]  }
  0x8d   :  { %863 = vmatprep.subr.bf16.mxu0 %v1520_v56  ;;  %809 = vmatprep.subr.bf16.mxu1 %v1626_v21  ;;  %v1601_v56 = vld [vmem:[#allocation5 + $0x314] ss:$8 sps:$4 sm:$0xff]   ;;  %v1607_v59 = vld [vmem:[#allocation5 + $0x324] ss:$8 sps:$4 sm:$0xff]   ;;  %v210_v21 = vshrl.u32 %v209_v20, 7 }
  0x8f   :  { %810 = vmatpush1.bf16.msra.mxu1 %v1628_v23  ;;  %v207_v23 = vld [vmem:[%s1900_s2] sm:$0x3]  ;;  %v215_v24 = vsub.s32 1, %v210_v21 }
  0x90   :  { %864 = vmatpush1.bf16.msra.mxu0 %v1518_v60  ;;  %1392 = vmatprep.subr.bf16.mxu1 %v1635_v26  ;;  %v1605_v60 = vld [vmem:[#allocation5 + $0x320] ss:$8 sps:$4 sm:$0xff]  }
  0x91   :  { %865 = vmatprep.subr.bf16.mxu0 %v1523_v61  ;;  %v1613_v61 = vld [vmem:[#allocation5 + $0x334] ss:$8 sps:$4 sm:$0xff]   ;;  %v216_v26 = vrot.slane %v207_v23, %v215_v24 }
  0x92   :  { %812 = vmatmul.mubr.bf16.vlgmr.msra.gmra.mrb[0].mxu1 %v88_v30 }
  0x93   :  { %1393 = vmatpush3.bf16.msra.mxu1 %v1636_v28 }
  0x94   :  { %866 = vmatpush1.bf16.msra.mxu0 %v1521_v0  ;;  %1394 = vmatprep.subr.bf16.mxu1 %v1637_v31  ;;  %v1617_v0 = vld [vmem:[#allocation5 + $0x340] ss:$8 sps:$4 sm:$0xff]  }
  0x95   :  { %867 = vmatprep.subr.bf16.mxu0 %v1526_v1  ;;  %v1625_v1 = vld [vmem:[#allocation5 + $0x354] ss:$8 sps:$4 sm:$0xff]  }
  0x97   :  { %1395 = vmatpush3.bf16.msra.mxu1 %v1638_v33 }
  0x98   :  { %868 = vmatpush1.bf16.msra.mxu0 %v1524_v4  ;;  %1396 = vmatprep.subr.bf16.mxu1 %v1639_v35  ;;  %v1629_v4 = vld [vmem:[#allocation5 + $0x360] ss:$8 sps:$4 sm:$0xff]  }
  0x99   :  { %869 = vmatprep.subr.bf16.mxu0 %v1529_v8  ;;  %v94_v8 = vpack.c.bf16 %v87_v7, %v87_v7 }
  0x9b   :  { %1397 = vmatpush3.bf16.msra.mxu1 %v1640_v37 }
  0x9c   :  { %870 = vmatpush1.bf16.msra.mxu0 %v1527_v10  ;;  %1398 = vmatprep.subr.bf16.mxu1 %v1641_v39  ;;  %v1646_v10 = vld [vmem:[#allocation7 + $0x28] sm:$0xff]  }
  0x9d   :  { %871 = vmatprep.subr.bf16.mxu0 %v1532_v11  ;;  %v1647_v11 = vld [vmem:[#allocation7 + $0x70] sm:$0xff]  }
  0x9f   :  { %1399 = vmatpush3.bf16.msra.mxu1 %v1642_v41  ;;  %v1653_v41 = vld [vmem:[#allocation8 + $0x10] sm:$0xff]  }
  0xa0   :  { %872 = vmatpush1.bf16.msra.mxu0 %v1530_v14  ;;  %1400 = vmatprep.subr.bf16.mxu1 %v1643_v43  ;;  %v1650_v14 = vld [vmem:[#allocation7 + $0x38] sm:$0xff]   ;;  %v1655_v43 = vld [vmem:[#allocation8 + $0x20] sm:$0xff]  }
  0xa1   :  { %873 = vmatprep.subr.bf16.mxu0 %v1535_v15  ;;  %v1786_v15 = vmov 0.0  }
  0xa3   :  { %1401 = vmatpush3.bf16.msra.mxu1 %v1644_v45  ;;  %v1657_v45 = vld [vmem:[#allocation8 + $0x30] sm:$0xff]  }
  0xa4   :  { %874 = vmatpush1.bf16.msra.mxu0 %v1533_v18  ;;  %1402 = vmatprep.subr.bf16.mxu1 %v1645_v9 }
  0xa5   :  { %875 = vmatprep.subr.bf16.mxu0 %v1541_v19 }
  0xa7   :  { %1403 = vmatpush3.bf16.msra.mxu1 %v1646_v10 }
  0xa8   :  { %876 = vmatpush1.bf16.msra.mxu0 %v1539_v22  ;;  %1404 = vmatprep.subr.bf16.mxu1 %v1647_v11  ;;  %v211_v22 = vsub.s32 0, %v210_v21 }
  0xa9   :  { %877 = vmatprep.subr.bf16.mxu0 %v1547_v25 }
  0xaa   :  { %v212_v25 = vrot.slane %v207_v23, %v211_v22 }
  0xab   :  { %1405 = vmatpush3.bf16.msra.mxu1 %v1648_v12 }
  0xac   :  { %878 = vmatpush1.bf16.msra.mxu0 %v1545_v27  ;;  %1406 = vmatprep.subr.bf16.mxu1 %v1649_v13 }
  0xad   :  { %879 = vmatprep.subr.bf16.mxu0 %v1553_v29 }
  0xaf   :  { %1407 = vmatpush3.bf16.msra.mxu1 %v1650_v14 }
  0xb0   :  { %880 = vmatpush1.bf16.msra.mxu0 %v1551_v32  ;;  %1423 = vmatprep.subr.bf16.mxu1 %v1786_v15 }
  0xb1   :  { %881 = vmatprep.subr.bf16.mxu0 %v1559_v34 }
  0xb4   :  { %882 = vmatpush1.bf16.msra.mxu0 %v1557_v36 }
  0xb5   :  { %883 = vmatprep.subr.bf16.mxu0 %v1565_v38  ;;  %v1651_v38 = vld [vmem:[#allocation8] sm:$0xff]  }
  0xb8   :  { %884 = vmatpush1.bf16.msra.mxu0 %v1563_v40  ;;  %v1652_v40 = vld [vmem:[#allocation8 + $0x8] sm:$0xff]  }
  0xb9   :  { %885 = vmatprep.subr.bf16.mxu0 %v1571_v42  ;;  %v1654_v42 = vld [vmem:[#allocation8 + $0x18] sm:$0xff]  }
  0xbc   :  { %886 = vmatpush1.bf16.msra.mxu0 %v1569_v44  ;;  %v1656_v44 = vld [vmem:[#allocation8 + $0x28] sm:$0xff]  }
  0xbd   :  { %887 = vmatprep.subr.bf16.mxu0 %v1577_v46  ;;  %v1658_v46 = vld [vmem:[#allocation8 + $0x38] sm:$0xff]  }
  0xc0   :  { %888 = vmatpush1.bf16.msra.mxu0 %v1575_v47 }
  0xc1   :  { %889 = vmatprep.subr.bf16.mxu0 %v1583_v48  ;;  %v1366_v48 = vld [vmem:[%s1902_s4] ss:$0 sm:$0xff]  ;;  %s1747_s4 = scalar_lea.vmem %s1244_s8, 64 }
  0xc2   :  { %p1748_p4 = scmp.ne.s32.totalorder %s1244_s8, %s1747_s4  ;;  %p1753_p6 = scmp.lt.s32.totalorder %s1747_s4, %s1747_s4 }
  0xc4   :  { %890 = vmatpush1.bf16.msra.mxu0 %v1581_v49  ;;  %p1754_p7 = por %p1753_p6, %p1752_p5 }
  0xc5   :  { %891 = vmatprep.subr.bf16.mxu0 %v1589_v50 }
  0xc6   :  { %p1755_p8 = pnand %p1754_p7, %p1748_p4 }
  0xc8   :  { %892 = vmatpush1.bf16.msra.mxu0 %v1587_v51 }
  0xc9   :  { %902 = vmatprep.subr.bf16.mxu0 %v1595_v53 }
  0xcb   :  { %894 = vmatmul.mubr.bf16.vlgmr.msra.gmra.mrb[0].mxu0 %v92_v54 }
  0xcc   :  { %903 = vmatpush1.bf16.msra.mxu0 %v1593_v55  ;;  %934 = vmatprep.mubr.bf16.mxu0 %v1785_v58 }
  0xcd   :  { %904 = vmatprep.subr.bf16.mxu0 %v1601_v56  ;;  %v1383_v56 = vld [vmem:[%s1904_s6] ss:$0 sm:$0xff] }
  0xd0   :  { %905 = vmatpush1.bf16.msra.mxu0 %v1599_v57 }
  0xd1   :  { %906 = vmatprep.subr.bf16.mxu0 %v1607_v59 }
  0xd4   :  { %907 = vmatpush1.bf16.msra.mxu0 %v1605_v60 }
  0xd5   :  { %908 = vmatprep.subr.bf16.mxu0 %v1613_v61 }
  0xd8   :  { %909 = vmatpush1.bf16.msra.mxu0 %v1611_v62 }
  0xd9   :  { %910 = vmatprep.subr.bf16.mxu0 %v1619_v63 }
  0xdc   :  { %911 = vmatpush1.bf16.msra.mxu0 %v1617_v0 }
  0xdd   :  { %912 = vmatprep.subr.bf16.mxu0 %v1625_v1 }
  0xe0   :  { %913 = vmatpush1.bf16.msra.mxu0 %v1623_v2 }
  0xe1   :  { %914 = vmatprep.subr.bf16.mxu0 %v1631_v3 }
  0xe4   :  { %915 = vmatpush1.bf16.msra.mxu0 %v1629_v4 }
  0xe5   :  { %916 = vmatprep.subr.bf16.mxu0 %v1634_v5 }
  0xe8   :  { %917 = vmatpush1.bf16.msra.mxu0 %v1632_v6 }
  0xeb   :  { %935 = vmatmul.mubr.bf16.vlgmr.msra.gmra.mrb[0].mxu0 %v94_v8 }
 0x165   :  { %v813_v16 = vpop.f32.mrb[0].mxu1 }
 0x166   :  { %v815_v17 = vpop.f32.mrb[1].mxu1  ;;  %v814_v27 = vadd.f32 %v813_v16, %v212_v25 }
 0x167   :  { %v817_v18 = vpop.f32.mrb[2].mxu1  ;;  %v816_v28 = vadd.f32 %v815_v17, %v216_v26 }
 0x168   :  { %v818_v19 = vpop.f32.mrb[3].mxu1 }
 0x1be   :  { %v936_v29 = vpop.f32.mrb[0].mxu0 }
 0x1bf   :  { %v1444_v30 = vadd.f32 %v936_v29, %v814_v27  ;;  %v938_v31 = vpop.f32.mrb[1].mxu0 }
 0x1c0   :  { %v1446_v32 = vadd.f32 %v938_v31, %v816_v28  ;;  %v940_v33 = vpop.f32.mrb[2].mxu0 }
 0x1c1   :  { %v943_v34 = vmax.f32 %v1444_v30, 0.0  ;;  %v941_v35 = vpop.f32.mrb[3].mxu0 }
 0x1c2   :  { %v944_v36 = vmax.f32 %v1446_v32, 0.0 }
 0x1c3   :  { %v945_v39 = vpack.c.bf16 %v943_v34, %v943_v34 }
 0x1c4   :  { %v946_v37 = vpack.c.bf16 %v944_v36, %v944_v36 }
 0x1c6   :  { %1114 = vmatprep.mubr.bf16.mxu1 %v946_v37 }
 0x1c7   :  { %1115 = vmatmul.mubr.bf16.vlgmr.msra.gmra.mrb[4].mxu1 %v945_v39 }
 0x1c8   :  { %1424 = vmatpush3.bf16.msra.mxu1 %v1651_v38  ;;  %1439 = vmatprep.mubr.msk.bf16.mxu1 %vm1787_vm0, %v1786_v15 }
 0x1c9   :  { %1425 = vmatprep.subr.bf16.mxu1 %v1786_v15 }
 0x1cc   :  { %1426 = vmatpush3.bf16.msra.mxu1 %v1652_v40 }
 0x1cd   :  { %1427 = vmatprep.subr.bf16.mxu1 %v1786_v15 }
 0x1d0   :  { %1428 = vmatpush3.bf16.msra.mxu1 %v1653_v41 }
 0x1d1   :  { %1429 = vmatprep.subr.bf16.mxu1 %v1786_v15 }
 0x1d4   :  { %1430 = vmatpush3.bf16.msra.mxu1 %v1654_v42 }
 0x1d5   :  { %1431 = vmatprep.subr.bf16.mxu1 %v1786_v15 }
 0x1d8   :  { %1432 = vmatpush3.bf16.msra.mxu1 %v1655_v43 }
 0x1d9   :  { %1433 = vmatprep.subr.bf16.mxu1 %v1786_v15 }
 0x1dc   :  { %1434 = vmatpush3.bf16.msra.mxu1 %v1656_v44 }
 0x1dd   :  { %1435 = vmatprep.subr.bf16.mxu1 %v1786_v15 }
 0x1e0   :  { %1436 = vmatpush3.bf16.msra.mxu1 %v1657_v45 }
 0x1e1   :  { %1437 = vmatprep.subr.bf16.mxu1 %v1786_v15 }
 0x1e4   :  { %1438 = vmatpush3.bf16.msra.mxu1 %v1658_v46 }
 0x29a   :  { %v1408_v47 = vpop.f32.mrb[4].mxu1 }
 0x29b   :  { %v1409_v49 = vpop.f32.mrb[5].mxu1 }
 0x29c   :  { %v1410_v50 = vadd.f32 %v1409_v49, %v1408_v47  ;;  %v1411_v51 = vpop.f32.mrb[6].mxu1 }
 0x29d   :  { %v1412_v52 = vpop.f32.mrb[7].mxu1 }
 0x29e   :  { %v1117_v53 = vadd.f32 %v1410_v50, %v1366_v48 }
 0x2a0   :  { %v1122_v54 = vmax.f32 %v1117_v53, 0.0 }
 0x2a2   :  { %v1123_v55 = vpack.c.bf16 %v1122_v54, %v1122_v54 }
 0x2a4   :  { %1440 = vmatmul.mubr.bf16.vlgmr.msra.gmra.mrb[8].mxu1 %v1123_v55 }
 0x377   :  { %v1229_v57 = vpop.f32.mrb[8].mxu1 }
 0x378   :  { %v1230_v58 = vadd.f32 %v1383_v56, %v1229_v57  ;;  %v1441_v59 = vpop.f32.mrb[9].mxu1 }
 0x379   :  { %v1232_v60 = vpop.f32.mrb[10].mxu1 }
 0x37a   :  { %v1235_v61 = vpack.c.bf16 %v1230_v58, %v1230_v58  ;;  %v1442_v62 = vpop.f32.mrb[11].mxu1 }
 0x37c   :  { %1236 = vst [vmem:[#allocation10] sm:$0xf] %v1235_v61 }
 0x37d   :  { %1758 = shalt.err (!%p1755_p8)
}
 0x37e   :  { %s1759_s6 = scalar_lea.hbm %s1905_s7, 64 }
 0x37f   :  { %p1760_p9 = scmp.ne.s32.totalorder %s1905_s7, %s1759_s6  ;;  %p1763_p10 = scmp.lt.u32.totalorder %s1759_s6, %s1905_s7 }
 0x381   :  { %p1765_p11 = pnand %p1763_p10, %p1760_p9 }
 0x383   :  { %1768 = shalt.err (!%p1765_p11)
}
 0x384   :  { %1246 = dma.vmem_to_hbm [thread:$0]  %s1244_s8, 64, %s1905_s7, [#allocation4]  }
 0x385   :  { %1775 = dma.done.wait [#allocation4], 64  }
 0x386   :  { %1776 = vsyncadd [#allocation4], 4294967232 }
 0x387   :  { %1250 = vsyncpa [#allocation3], 1 }
 0x388   :  { %1251 = vsyncpa [#allocation6], 1 }
 0x389   :  { %1252 = vsyncpa [#allocation9], 1 }
 0x38a   :  { %1253 = vsyncpa [#allocation4], 1 }

</bundles_post_ra>
